<compile_context>
chip_gen: v7x
topology: tpu7x:2x2x1
jax: 0.10.0
libtpu: 0.0.40
codegen_flags: <defaults>
</compile_context>

<pallas_src>
import functools

import jax
import jax.numpy as jnp
import numpy as np
from jax.experimental import pallas as pl
from jax.experimental.pallas import tpu as pltpu


def _round_up(a, m):
    return (a + m - 1) // m * m


# ----------------------------------------------------------------------------- kernel
def _picnn2_kernel(num_param_layers, num_out_layers, kp_width,
                   x_ref, p_ref, lw_ref, lb_ref, uvw_w_ref, uvw_b_ref, ab_w_ref,
                   out_ref):
    """One batch tile.

    x_ref    : (TB, KP)           padded input x0
    p_ref    : (TB, PP)           padded parameter eta_0
    lw_ref   : (nL, PP, PP)       parameter-net weights (pre-transposed, zero-padded)
    lb_ref   : (nL, 1, PP)        parameter-net biases
    uvw_w_ref: (nJ, PP, 3*KP)     [U_k | V_k | W_k] fused head weights
    uvw_b_ref: (nJ, 1, 3*KP)      [U_b | V_b | W_b + A_b] fused head biases
    ab_w_ref : (nJ, 2*KP, KP)     [exp(A_k) ; B_k] stacked propagation/residual weights
    out_ref  : (TB, KP)
    """
    x0 = x_ref[...]
    eta = p_ref[...]

    # ---- parameter net L (ReLU on hidden layers, identity on last) ----
    for i in range(num_param_layers):
        eta = jnp.dot(eta, lw_ref[i], preferred_element_type=jnp.float32) + lb_ref[i]
        if i < num_param_layers - 1:
            eta = jnp.maximum(eta, 0.0)

    # ---- output net with fused parameter heads ----
    x = x0
    for k in range(num_out_layers):
        # single MXU call for all three heads
        uvw = jnp.dot(eta, uvw_w_ref[k], preferred_element_type=jnp.float32) + uvw_b_ref[k]
        u = jnp.maximum(uvw[:, :kp_width], 0.0)          # floor_func = ReLU
        v = uvw[:, kp_width:2 * kp_width]
        w = uvw[:, 2 * kp_width:]                          # already contains A_b

        # single MXU call for propagation + residual: [x*u, x0*v] @ [exp(A); B]
        xu_x0v = jnp.concatenate([x * u, x0 * v], axis=1)  # (TB, 2*KP), lane-aligned concat
        x = jnp.dot(xu_x0v, ab_w_ref[k], preferred_element_type=jnp.float32) + w

        if k < num_out_layers - 1:                          # hidden = ReLU, output = Identity
            x = jnp.maximum(x, 0.0)

    out_ref[...] = x


# ----------------------------------------------------------------------------- packing
def _pad_to(a, shape):
    pads = [(0, s - d) for d, s in zip(a.shape, shape)]
    return jnp.pad(a.astype(jnp.float32), pads)


def _pack_params(params, KP, PP):
    """Pad every feature dim to the lane-dense width and pack into 5 slabs.

    exp() of the A raw weights is applied here (hoisted out of the kernel), and the A bias
    is folded into the W-head bias, so the kernel never touches A_b separately.
    """
    nL = len(params["L_W"])
    nJ = len(params["A_Wraw"])

    L_W = jnp.stack([_pad_to(params["L_W"][i], (PP, PP)) for i in range(nL)])
    L_b = jnp.stack([_pad_to(params["L_b"][i], (1, PP)) for i in range(nL)])

    uvw_w, uvw_b, ab_w = [], [], []
    for k in range(nJ):
        U = _pad_to(params["U_W"][k], (PP, KP))
        V = _pad_to(params["V_W"][k], (PP, KP))
        W = _pad_to(params["W_W"][k], (PP, KP))
        uvw_w.append(jnp.concatenate([U, V, W], axis=1))

        Ub = _pad_to(params["U_b"][k], (1, KP))
        Vb = _pad_to(params["V_b"][k], (1, KP))
        Wb = _pad_to(params["W_b"][k], (1, KP)) + _pad_to(params["A_b"][k], (1, KP))
        uvw_b.append(jnp.concatenate([Ub, Vb, Wb], axis=1))

        expA = _pad_to(jnp.exp(params["A_Wraw"][k].astype(jnp.float32)), (KP, KP))
        B = _pad_to(params["B_W"][k], (KP, KP))
        ab_w.append(jnp.concatenate([expA, B], axis=0))

    return L_W, L_b, jnp.stack(uvw_w), jnp.stack(uvw_b), jnp.stack(ab_w)


# ----------------------------------------------------------------------------- wrapper
def picnn2_forward(x, param, params, *, batch_tile=256):
    """params: dict with lists 'L_W','L_b','A_Wraw','A_b','B_W','U_W','U_b','V_W','V_b','W_W','W_b'.

    Weights are stored pre-transposed as (in, out).  batch_tile ~256 keeps the per-tile VMEM
    footprint well inside v7x's 64 MiB budget while saturating the HBM pipeline.
    """
    nL = len(params["L_W"])
    nJ = len(params["A_Wraw"])

    batch, k0 = x.shape
    p0 = param.shape[1]
    out_dim = params["A_Wraw"][-1].shape[1]

    # Lane-dense padded widths (multiples of 128) shared by all layers.
    k_dims = [k0] + [w.shape[1] for w in params["A_Wraw"]]
    p_dims = [p0] + [w.shape[1] for w in params["L_W"]]
    KP = _round_up(max(k_dims), 128)
    PP = _round_up(max(p_dims), 128)

    # Batch tiling: sublane-aligned tiles, batch padded up to a whole number of tiles.
    batch_tile = max(8, _round_up(batch_tile, 8))
    tb = min(batch_tile, _round_up(batch, 8))
    pb = _round_up(batch, tb)

    x_p = jnp.zeros((pb, KP), jnp.float32).at[:batch, :k0].set(x.astype(jnp.float32))
    eta_p = jnp.zeros((pb, PP), jnp.float32).at[:batch, :p0].set(param.astype(jnp.float32))

    L_W, L_b, UVW_W, UVW_b, AB_W = _pack_params(params, KP, PP)

    kernel = functools.partial(_picnn2_kernel, nL, nJ, KP)

    def resident(shape):
        # Constant block index: DMA once, stays in VMEM across all batch tiles.
        return pl.BlockSpec(shape, lambda i, _s=len(shape): (0,) * _s)

    out = pl.pallas_call(
        kernel,
        out_shape=jax.ShapeDtypeStruct((pb, KP), jnp.float32),
        grid=(pb // tb,),
        in_specs=[
            pl.BlockSpec((tb, KP), lambda i: (i, 0)),   # x : pipelined over batch
            pl.BlockSpec((tb, PP), lambda i: (i, 0)),   # param : pipelined over batch
            resident(L_W.shape),
            resident(L_b.shape),
            resident(UVW_W.shape),
            resident(UVW_b.shape),
            resident(AB_W.shape),
        ],
        out_specs=pl.BlockSpec((tb, KP), lambda i: (i, 0)),
        compiler_params=pltpu.CompilerParams(
            dimension_semantics=("parallel",)),         # v7x: shard batch tiles across both TCs
    )(x_p, eta_p, L_W, L_b, UVW_W, UVW_b, AB_W)

    return out[:batch, :out_dim]


# ----------------------------------------------------------------------------- reference
def picnn2_reference(x, param, params):
    eta = param
    nL = len(params["L_W"])
    for i in range(nL):
        eta = eta @ params["L_W"][i] + params["L_b"][i]
        if i < nL - 1:
            eta = jnp.maximum(eta, 0.0)
    x0 = x
    nJ = len(params["A_Wraw"])
    xk = x0
    for k in range(nJ):
        u = jnp.maximum(eta @ params["U_W"][k] + params["U_b"][k], 0.0)
        v = eta @ params["V_W"][k] + params["V_b"][k]
        w = eta @ params["W_W"][k] + params["W_b"][k]
        prop = (xk * u) @ jnp.exp(params["A_Wraw"][k]) + params["A_b"][k]
        res = (x0 * v) @ params["B_W"][k]
        xk = prop + res + w
        if k < nJ - 1:
            xk = jnp.maximum(xk, 0.0)
    return xk


# ----------------------------------------------------------------------------- params
def init_params(key, output_net_size, param_net_size):
    """Deterministic synthetic initialization. Weights stored pre-transposed as (in, out)."""
    def linear(key, fan_in, fan_out, scale=0.2):
        kw, kb = jax.random.split(key)
        W = jax.random.uniform(kw, (fan_in, fan_out), jnp.float32, -scale, scale)
        b = jax.random.uniform(kb, (1, fan_out), jnp.float32, -scale, scale)
        return W, b

    params = {k: [] for k in
              ["L_W", "L_b", "A_Wraw", "A_b", "B_W", "U_W", "U_b", "V_W", "V_b", "W_W", "W_b"]}

    keys = jax.random.split(key, 64)
    ki = 0
    # parameter net L  (sizes p_0 .. p_{I+1})
    for i in range(len(param_net_size) - 1):
        W, b = linear(keys[ki], param_net_size[i], param_net_size[i + 1]); ki += 1
        params["L_W"].append(W); params["L_b"].append(b)

    p_last = param_net_size[-1]
    k0 = output_net_size[0]
    # output-net layers and parameter heads (sizes k_0 .. k_{J+1})
    for j in range(len(output_net_size) - 1):
        kin, kout = output_net_size[j], output_net_size[j + 1]
        Wa, ba = linear(keys[ki], kin, kout); ki += 1       # A_j: raw weights (exp-constrained)
        params["A_Wraw"].append(Wa); params["A_b"].append(ba)
        Wb, _ = linear(keys[ki], k0, kout); ki += 1         # B_j: bias=False
        params["B_W"].append(Wb)
        Wu, bu = linear(keys[ki], p_last, kin); ki += 1     # U_j
        params["U_W"].append(Wu); params["U_b"].append(bu)
        Wv, bv = linear(keys[ki], p_last, k0); ki += 1      # V_j
        params["V_W"].append(Wv); params["V_b"].append(bv)
        Ww, bw = linear(keys[ki], p_last, kout); ki += 1    # W_j
        params["W_W"].append(Ww); params["W_b"].append(bw)
    return params


# ----------------------------------------------------------------------------- main
if __name__ == "__main__":
    # Equal number of layers in the output net and the parameter net, matching the PyTorch
    # module's `for k in range(len(self.L))` indexing all of A/B/U/V/W exactly once.
    output_net_size = (16, 32, 8)   # k_0, k_1, k_2
    param_net_size = (8, 16, 16)    # p_0, p_1, p_2
    batch = 32

    key = jax.random.PRNGKey(0)
    kx, kpar, kparams = jax.random.split(key, 3)
    x = jax.random.normal(kx, (batch, output_net_size[0]), jnp.float32)
    param = jax.random.normal(kpar, (batch, param_net_size[0]), jnp.float32)
    params = init_params(kparams, output_net_size, param_net_size)

    # batch_tile=8 -> grid=(4,): exercises the batch pipeline with resident weights.
    out = picnn2_forward(x, param, params, batch_tile=8)
    out = jax.block_until_ready(out)

    ref = picnn2_reference(x, param, params)
    np.testing.assert_allclose(np.asarray(out), np.asarray(ref), rtol=1e-5, atol=1e-5)

    print("KERNEL_OK")
</pallas_src>

<mosaic_0001>
module attributes {stable_mosaic.version = 11 : i64} {
  func.func @_picnn2_kernel(%arg0: i32, %arg1: memref<8x128xf32, #tpu.memory_space<vmem>>, %arg2: memref<8x128xf32, #tpu.memory_space<vmem>>, %arg3: memref<2x128x128xf32, #tpu.memory_space<vmem>>, %arg4: memref<2x1x128xf32, #tpu.memory_space<vmem>>, %arg5: memref<2x128x384xf32, #tpu.memory_space<vmem>>, %arg6: memref<2x1x384xf32, #tpu.memory_space<vmem>>, %arg7: memref<2x256x128xf32, #tpu.memory_space<vmem>>, %arg8: memref<8x128xf32, #tpu.memory_space<vmem>>) attributes {dimension_semantics = [#tpu.dimension_semantics<parallel>], iteration_bounds = array<i64: 4>, scalar_prefetch = 0 : i64, scratch_operands = 0 : i64, tpu.core_type = #tpu.core_type<tc>, window_params = [{transform_indices = @transform_0, window_bounds = array<i64: 8, 128>}, {transform_indices = @transform_1, window_bounds = array<i64: 8, 128>}, {pipeline_mode = #tpu.pipeline_mode<synchronous>, transform_indices = @transform_2, window_bounds = array<i64: 2, 128, 128>}, {pipeline_mode = #tpu.pipeline_mode<synchronous>, transform_indices = @transform_3, window_bounds = array<i64: 2, 1, 128>}, {pipeline_mode = #tpu.pipeline_mode<synchronous>, transform_indices = @transform_4, window_bounds = array<i64: 2, 128, 384>}, {pipeline_mode = #tpu.pipeline_mode<synchronous>, transform_indices = @transform_5, window_bounds = array<i64: 2, 1, 384>}, {pipeline_mode = #tpu.pipeline_mode<synchronous>, transform_indices = @transform_6, window_bounds = array<i64: 2, 256, 128>}, {transform_indices = @transform_7, window_bounds = array<i64: 8, 128>}]} {
    %c0 = arith.constant 0 : index
    %c0_0 = arith.constant 0 : index
    %0 = vector.load %arg1[%c0, %c0_0] : memref<8x128xf32, #tpu.memory_space<vmem>>, vector<8x128xf32>
    %c0_1 = arith.constant 0 : index
    %c0_2 = arith.constant 0 : index
    %1 = vector.load %arg2[%c0_1, %c0_2] : memref<8x128xf32, #tpu.memory_space<vmem>>, vector<8x128xf32>
    %c0_3 = arith.constant 0 : index
    %c0_4 = arith.constant 0 : index
    %c0_5 = arith.constant 0 : index
    %2 = vector.load %arg3[%c0_3, %c0_4, %c0_5] : memref<2x128x128xf32, #tpu.memory_space<vmem>>, vector<1x128x128xf32>
    %3 = vector.shape_cast %2 : vector<1x128x128xf32> to vector<128x128xf32>
    %cst = arith.constant dense<0.000000e+00> : vector<8x128xf32>
    %4 = tpu.matmul %1, %3, %cst {dimension_numbers = #tpu.dot_dimension_numbers<[1], [0], [0], [1], [0, 0, 1, 1], [], []>} : vector<8x128xf32>, vector<128x128xf32>, vector<8x128xf32> -> vector<8x128xf32>
    %c0_6 = arith.constant 0 : index
    %c0_7 = arith.constant 0 : index
    %c0_8 = arith.constant 0 : index
    %5 = vector.load %arg4[%c0_6, %c0_7, %c0_8] : memref<2x1x128xf32, #tpu.memory_space<vmem>>, vector<1x1x128xf32>
    %6 = vector.shape_cast %5 : vector<1x1x128xf32> to vector<1x128xf32>
    %7 = vector.broadcast %6 : vector<1x128xf32> to vector<8x128xf32>
    %8 = arith.addf %4, %7 : vector<8x128xf32>
    %cst_9 = arith.constant 0.000000e+00 : f32
    %9 = vector.broadcast %cst_9 : f32 to vector<8x128xf32>
    %10 = arith.maximumf %8, %9 : vector<8x128xf32>
    %c1 = arith.constant 1 : index
    %c0_10 = arith.constant 0 : index
    %c0_11 = arith.constant 0 : index
    %11 = vector.load %arg3[%c1, %c0_10, %c0_11] : memref<2x128x128xf32, #tpu.memory_space<vmem>>, vector<1x128x128xf32>
    %12 = vector.shape_cast %11 : vector<1x128x128xf32> to vector<128x128xf32>
    %cst_12 = arith.constant dense<0.000000e+00> : vector<8x128xf32>
    %13 = tpu.matmul %10, %12, %cst_12 {dimension_numbers = #tpu.dot_dimension_numbers<[1], [0], [0], [1], [0, 0, 1, 1], [], []>} : vector<8x128xf32>, vector<128x128xf32>, vector<8x128xf32> -> vector<8x128xf32>
    %c1_13 = arith.constant 1 : index
    %c0_14 = arith.constant 0 : index
    %c0_15 = arith.constant 0 : index
    %14 = vector.load %arg4[%c1_13, %c0_14, %c0_15] : memref<2x1x128xf32, #tpu.memory_space<vmem>>, vector<1x1x128xf32>
    %15 = vector.shape_cast %14 : vector<1x1x128xf32> to vector<1x128xf32>
    %16 = vector.broadcast %15 : vector<1x128xf32> to vector<8x128xf32>
    %17 = arith.addf %13, %16 : vector<8x128xf32>
    %c0_16 = arith.constant 0 : index
    %c0_17 = arith.constant 0 : index
    %c0_18 = arith.constant 0 : index
    %18 = vector.load %arg5[%c0_16, %c0_17, %c0_18] : memref<2x128x384xf32, #tpu.memory_space<vmem>>, vector<1x128x384xf32>
    %19 = vector.shape_cast %18 : vector<1x128x384xf32> to vector<128x384xf32>
    %cst_19 = arith.constant dense<0.000000e+00> : vector<8x384xf32>
    %20 = tpu.matmul %17, %19, %cst_19 {dimension_numbers = #tpu.dot_dimension_numbers<[1], [0], [0], [1], [0, 0, 1, 1], [], []>} : vector<8x128xf32>, vector<128x384xf32>, vector<8x384xf32> -> vector<8x384xf32>
    %c0_20 = arith.constant 0 : index
    %c0_21 = arith.constant 0 : index
    %c0_22 = arith.constant 0 : index
    %21 = vector.load %arg6[%c0_20, %c0_21, %c0_22] : memref<2x1x384xf32, #tpu.memory_space<vmem>>, vector<1x1x384xf32>
    %22 = vector.shape_cast %21 : vector<1x1x384xf32> to vector<1x384xf32>
    %23 = vector.broadcast %22 : vector<1x384xf32> to vector<8x384xf32>
    %24 = arith.addf %20, %23 : vector<8x384xf32>
    %25 = vector.extract_strided_slice %24 {offsets = [0, 0], sizes = [8, 128], strides = [1, 1]} : vector<8x384xf32> to vector<8x128xf32>
    %cst_23 = arith.constant 0.000000e+00 : f32
    %26 = vector.broadcast %cst_23 : f32 to vector<8x128xf32>
    %27 = arith.maximumf %25, %26 : vector<8x128xf32>
    %28 = vector.extract_strided_slice %24 {offsets = [0, 128], sizes = [8, 128], strides = [1, 1]} : vector<8x384xf32> to vector<8x128xf32>
    %29 = vector.extract_strided_slice %24 {offsets = [0, 256], sizes = [8, 128], strides = [1, 1]} : vector<8x384xf32> to vector<8x128xf32>
    %30 = arith.mulf %0, %27 : vector<8x128xf32>
    %31 = arith.mulf %0, %28 : vector<8x128xf32>
    %32 = tpu.concatenate %30, %31 in 1 : vector<8x128xf32>, vector<8x128xf32> -> vector<8x256xf32>
    %c0_24 = arith.constant 0 : index
    %c0_25 = arith.constant 0 : index
    %c0_26 = arith.constant 0 : index
    %33 = vector.load %arg7[%c0_24, %c0_25, %c0_26] : memref<2x256x128xf32, #tpu.memory_space<vmem>>, vector<1x256x128xf32>
    %34 = vector.shape_cast %33 : vector<1x256x128xf32> to vector<256x128xf32>
    %cst_27 = arith.constant dense<0.000000e+00> : vector<8x128xf32>
    %35 = tpu.matmul %32, %34, %cst_27 {dimension_numbers = #tpu.dot_dimension_numbers<[1], [0], [0], [1], [0, 0, 1, 1], [], []>} : vector<8x256xf32>, vector<256x128xf32>, vector<8x128xf32> -> vector<8x128xf32>
    %36 = arith.addf %35, %29 : vector<8x128xf32>
    %cst_28 = arith.constant 0.000000e+00 : f32
    %37 = vector.broadcast %cst_28 : f32 to vector<8x128xf32>
    %38 = arith.maximumf %36, %37 : vector<8x128xf32>
    %c1_29 = arith.constant 1 : index
    %c0_30 = arith.constant 0 : index
    %c0_31 = arith.constant 0 : index
    %39 = vector.load %arg5[%c1_29, %c0_30, %c0_31] : memref<2x128x384xf32, #tpu.memory_space<vmem>>, vector<1x128x384xf32>
    %40 = vector.shape_cast %39 : vector<1x128x384xf32> to vector<128x384xf32>
    %cst_32 = arith.constant dense<0.000000e+00> : vector<8x384xf32>
    %41 = tpu.matmul %17, %40, %cst_32 {dimension_numbers = #tpu.dot_dimension_numbers<[1], [0], [0], [1], [0, 0, 1, 1], [], []>} : vector<8x128xf32>, vector<128x384xf32>, vector<8x384xf32> -> vector<8x384xf32>
    %c1_33 = arith.constant 1 : index
    %c0_34 = arith.constant 0 : index
    %c0_35 = arith.constant 0 : index
    %42 = vector.load %arg6[%c1_33, %c0_34, %c0_35] : memref<2x1x384xf32, #tpu.memory_space<vmem>>, vector<1x1x384xf32>
    %43 = vector.shape_cast %42 : vector<1x1x384xf32> to vector<1x384xf32>
    %44 = vector.broadcast %43 : vector<1x384xf32> to vector<8x384xf32>
    %45 = arith.addf %41, %44 : vector<8x384xf32>
    %46 = vector.extract_strided_slice %45 {offsets = [0, 0], sizes = [8, 128], strides = [1, 1]} : vector<8x384xf32> to vector<8x128xf32>
    %cst_36 = arith.constant 0.000000e+00 : f32
    %47 = vector.broadcast %cst_36 : f32 to vector<8x128xf32>
    %48 = arith.maximumf %46, %47 : vector<8x128xf32>
    %49 = vector.extract_strided_slice %45 {offsets = [0, 128], sizes = [8, 128], strides = [1, 1]} : vector<8x384xf32> to vector<8x128xf32>
    %50 = vector.extract_strided_slice %45 {offsets = [0, 256], sizes = [8, 128], strides = [1, 1]} : vector<8x384xf32> to vector<8x128xf32>
    %51 = arith.mulf %38, %48 : vector<8x128xf32>
    %52 = arith.mulf %0, %49 : vector<8x128xf32>
    %53 = tpu.concatenate %51, %52 in 1 : vector<8x128xf32>, vector<8x128xf32> -> vector<8x256xf32>
    %c1_37 = arith.constant 1 : index
    %c0_38 = arith.constant 0 : index
    %c0_39 = arith.constant 0 : index
    %54 = vector.load %arg7[%c1_37, %c0_38, %c0_39] : memref<2x256x128xf32, #tpu.memory_space<vmem>>, vector<1x256x128xf32>
    %55 = vector.shape_cast %54 : vector<1x256x128xf32> to vector<256x128xf32>
    %cst_40 = arith.constant dense<0.000000e+00> : vector<8x128xf32>
    %56 = tpu.matmul %53, %55, %cst_40 {dimension_numbers = #tpu.dot_dimension_numbers<[1], [0], [0], [1], [0, 0, 1, 1], [], []>} : vector<8x256xf32>, vector<256x128xf32>, vector<8x128xf32> -> vector<8x128xf32>
    %57 = arith.addf %56, %50 : vector<8x128xf32>
    %c0_41 = arith.constant 0 : index
    %c0_42 = arith.constant 0 : index
    %58 = vector.load %arg8[%c0_41, %c0_42] : memref<8x128xf32, #tpu.memory_space<vmem>>, vector<8x128xf32>
    tpu.vector_store %arg8[%c0_41, %c0_42], %57 {strides = array<i32>} : memref<8x128xf32, #tpu.memory_space<vmem>>, vector<8x128xf32>,
    return
  }
  func.func @transform_0(%arg0: i32) -> (i32, i32) {
    %c0_i32 = arith.constant 0 : i32
    %c0_i32_0 = arith.constant 0 : i32
    return %arg0, %c0_i32 : i32, i32
  }
  func.func @transform_1(%arg0: i32) -> (i32, i32) {
    %c0_i32 = arith.constant 0 : i32
    %c0_i32_0 = arith.constant 0 : i32
    return %arg0, %c0_i32 : i32, i32
  }
  func.func @transform_2(%arg0: i32) -> (i32, i32, i32) {
    %c0_i32 = arith.constant 0 : i32
    %c0_i32_0 = arith.constant 0 : i32
    %c0_i32_1 = arith.constant 0 : i32
    %c0_i32_2 = arith.constant 0 : i32
    return %c0_i32, %c0_i32_0, %c0_i32_1 : i32, i32, i32
  }
  func.func @transform_3(%arg0: i32) -> (i32, i32, i32) {
    %c0_i32 = arith.constant 0 : i32
    %c0_i32_0 = arith.constant 0 : i32
    %c0_i32_1 = arith.constant 0 : i32
    %c0_i32_2 = arith.constant 0 : i32
    return %c0_i32, %c0_i32_0, %c0_i32_1 : i32, i32, i32
  }
  func.func @transform_4(%arg0: i32) -> (i32, i32, i32) {
    %c0_i32 = arith.constant 0 : i32
    %c0_i32_0 = arith.constant 0 : i32
    %c0_i32_1 = arith.constant 0 : i32
    %c0_i32_2 = arith.constant 0 : i32
    return %c0_i32, %c0_i32_0, %c0_i32_1 : i32, i32, i32
  }
  func.func @transform_5(%arg0: i32) -> (i32, i32, i32) {
    %c0_i32 = arith.constant 0 : i32
    %c0_i32_0 = arith.constant 0 : i32
    %c0_i32_1 = arith.constant 0 : i32
    %c0_i32_2 = arith.constant 0 : i32
    return %c0_i32, %c0_i32_0, %c0_i32_1 : i32, i32, i32
  }
  func.func @transform_6(%arg0: i32) -> (i32, i32, i32) {
    %c0_i32 = arith.constant 0 : i32
    %c0_i32_0 = arith.constant 0 : i32
    %c0_i32_1 = arith.constant 0 : i32
    %c0_i32_2 = arith.constant 0 : i32
    return %c0_i32, %c0_i32_0, %c0_i32_1 : i32, i32, i32
  }
  func.func @transform_7(%arg0: i32) -> (i32, i32) {
    %c0_i32 = arith.constant 0 : i32
    %c0_i32_0 = arith.constant 0 : i32
    return %arg0, %c0_i32 : i32, i32
  }
}

</mosaic_0001>

<bundles_post_ra>
// kernel: tpu_custom_call.1
= control target key start
LH: loop header
LB: loop body
LE: loop exit
PB: predicated region body
PF: predicated region fallthrough
CT: control target
= control target key end

     0   :  { %s2588_s0 = inlined_call_operand.hbm [shape: f32[32,128], index: 0, kind: input, shape index: {}]   ;;  %s2589_s1 = inlined_call_operand.hbm [shape: f32[32,128], index: 1, kind: input, shape index: {}]   ;;  %s2590_s2 = inlined_call_operand.hbm [shape: f32[2,128,128], index: 2, kind: input, shape index: {}]   ;;  %s2591_s3 = inlined_call_operand.vmem [shape: f32[2,1,128], index: 3, kind: input, shape index: {}]   ;;  %s2592_s4 = inlined_call_operand.hbm [shape: f32[2,128,384], index: 4, kind: input, shape index: {}]   ;;  %s2593_s5 = inlined_call_operand.vmem [shape: f32[2,1,384], index: 5, kind: input, shape index: {}]   ;;  %s2594_s6 = inlined_call_operand.hbm [shape: f32[2,256,128], index: 6, kind: input, shape index: {}]   ;;  %s2595_s7 = inlined_call_operand.hbm [shape: f32[32,128], index: 7, kind: output, shape index: {}]  }
   0x1   :  { %2603 = sst [smem:[#allocation18_spill]] %s2590_s2 }
   0x2   :  { %2604 = sst [smem:[#allocation19_spill]] %s2592_s4 }
   0x3   :  { %2605 = sst [smem:[#allocation20_spill]] %s2594_s6 }
   0x4   :  { %12 = vsyncpa [#allocation3], 0 }
   0x5   :  { %14 = vsyncpa [#allocation3 + $0x1], 0 }
   0x6   :  { %15 = vsyncpa [#allocation6], 0 }
   0x7   :  { %17 = vsyncpa [#allocation6 + $0x1], 0 }
   0x8   :  { %18 = vsyncpa [#allocation9], 0 }
   0x9   :  { %19 = vsyncpa [#allocation4], 0 }
   0xa   :  { %21 = vsyncpa [#allocation4 + $0x1], 0  ;;  %s2220_s24 = smov 0   ;;  %s2222_s25 = smov 0  }
   0xb   :  { %s2224_s26 = smov 0   ;;  %s2226_s27 = smov 0  }
   0xc LB: > { %s2241_s28 = sadd.s32 4294967295, %s2165_s27   ;;  %s1327_s29 = sadd.s32 4294967294, %s2165_s27   ;;  %s2165_s27 = sphi %s2226_s27, %s2632_s27   ;;  %s2161_s26 = sphi %s2224_s26, %s2631_s26   ;;  %s2157_s25 = sphi %s2222_s25, %s2630_s25   ;;  %s2153_s24 = sphi %s2220_s24, %s2629_s24  }
   0xd   : > { %p47_p0 = scmp.ne.s32.totalorder %s2157_s25, %s2153_s24  ;;  %p2596_p1 = scmp.eq.s32.totalorder %s2241_s28, 0 }
   0xe   : > { %p208_p3 = scmp.eq.s32.totalorder %s1327_s29, 3  ;;  %p1328_p5 = scmp.ge.s32.totalorder %s2165_s27, 1 }
   0xf   : > { %p2250_p4 = por %p2596_p1, %p47_p0  ;;  %p215_p7 = scmp.lt.s32.totalorder %s2165_s27, 5 }
  0x10   : > { %p2255_p6 = por %p208_p3, %p47_p0  ;;  %s2167_s10 = smov [#allocation7]  }
  0x11   : > { %s2606_s30 = scalar_select %p2250_p4, 1, 0 }
  0x12   : > { %s2607_s8 = scalar_select %p2255_p6, 1, 0 }
  0x13   : > { %p2260_p8 = pnand %p1328_p5, %p215_p7  ;;  %s227_s11 = sshll.u32 %s2167_s10, 4  ;;  %s228_s11 = int_to_ptr.vmem [resolvable:$true] %s227_s11 }
  0x14   : > { %2608 = sst [smem:[#allocation17_spill]] %s2607_s8  ;;  %s2168_s13 = smov [#allocation8]  }
  0x15   : > { %s2609_s9 = scalar_select %p2260_p8, 1, 0 }
  0x16   : > { %p1872_p9 = pneg %p2260_p8  ;;  %s243_s14 = sshll.u32 %s2168_s13, 4  ;;  %s2272_s14 = int_to_ptr.vmem [resolvable:$true] %s243_s14 }
  0x17   : > { %s2611_s2 = sld [smem:[#allocation18_spill]] }
  0x18   : > { %p2268_p10 = pnand %p1872_p9, %p2596_p1 }
  0x1a   : > { %p2282_p12 = pneg %p2268_p10 }
  0x1d   : > { %s1943_s17 = scalar_lea.hbm %s2611_s2, 4096 }
  0x1e   : > { %p1944_p11 = scmp.ne.s32.totalorder %s2611_s2, %s1943_s17  ;;  %p1950_p3 = scmp.lt.u32.totalorder %s1943_s17, %s2611_s2 }
  0x20   : > { %p1946_p13 = pnand %p2282_p12, %p1944_p11 }
  0x22   : > { %p1947_p0 = pneg %p1946_p13 }
  0x24   : > { %p1952_p5 = pnand %p1950_p3, %p1947_p0 }
  0x26   : > { %1955 = shalt.err (!%p1952_p5)
}
  0x27   : > { %s1956_s23 = scalar_lea.vmem %s228_s11, 4096  ;;  %p1964_p2 = scmp.lt.s32.totalorder %s228_s11, %s228_s11 }
  0x28   : > { %p1957_p7 = scmp.ne.s32.totalorder %s228_s11, %s1956_s23  ;;  %p1965_p6 = scmp.lt.s32.totalorder %s1956_s23, %s1956_s23 }
  0x2a   : > { %p1959_p9 = pnand %p1957_p7, %p2282_p12  ;;  %p1966_p4 = por %p1965_p6, %p1964_p2 }
  0x2c   : > { %p1960_p1 = pneg %p1959_p9 }
  0x2e   : > { %p1967_p8 = pnand %p1966_p4, %p1960_p1 }
  0x30   : > { %1970 = shalt.err (!%p1967_p8)
}
  0x31   : > { %s2599_s29 = smov 128   ;;  %s2600_s10 = smov 8  }
  0x32   : > { %1875 = dma.hbm_to_vmem [thread:$0]  (!%p2268_p10), %s2611_s2, 4096, %s228_s11, [#allocation6], %s2599_s29, %s2599_s29, %s2600_s10  }
  0x33   : > { %s2613_s4 = sld [smem:[#allocation19_spill]] }
  0x39   : > { %s1971_s18 = scalar_lea.hbm %s2613_s4, 12288 }
  0x3a   : > { %p1972_p1 = scmp.ne.s32.totalorder %s2613_s4, %s1971_s18  ;;  %p1978_p6 = scmp.lt.u32.totalorder %s1971_s18, %s2613_s4 }
  0x3c   : > { %p1974_p2 = pnand %p1972_p1, %p2282_p12 }
  0x3e   : > { %p1975_p4 = pneg %p1974_p2 }
  0x40   : > { %p1980_p8 = pnand %p1978_p6, %p1975_p4 }
  0x42   : > { %1983 = shalt.err (!%p1980_p8)
}
  0x43   : > { %s1984_s11 = scalar_lea.vmem %s2272_s14, 12288  ;;  %p1992_p3 = scmp.lt.s32.totalorder %s2272_s14, %s2272_s14 }
  0x44   : > { %p1985_p11 = scmp.ne.s32.totalorder %s2272_s14, %s1984_s11  ;;  %p1993_p5 = scmp.lt.s32.totalorder %s1984_s11, %s1984_s11 }
  0x46   : > { %p1987_p13 = pnand %p1985_p11, %p2282_p12  ;;  %p1994_p7 = por %p1993_p5, %p1992_p3 }
  0x48   : > { %p1988_p0 = pneg %p1987_p13 }
  0x4a   : > { %p1995_p9 = pnand %p1994_p7, %p1988_p0 }
  0x4c   : > { %1998 = shalt.err (!%p1995_p9)
}
  0x4d   : > { %s2171_s13 = smov 384   ;;  %s2172_s15 = smov 24  }
  0x4e   : > { %1878 = dma.hbm_to_vmem [thread:$0]  (!%p2268_p10), %s2613_s4, 12288, %s2272_s14, [#allocation9], %s2171_s13, %s2171_s13, %s2172_s15  }
  0x4f   : > { %s2173_s18 = smov [#allocation10]   ;;  %s2325_s21 = sadd.s32 1, %s2165_s27  }
  0x50   : > { %s259_s19 = sshll.u32 %s2173_s18, 4  ;;  %s2614_s6 = sld [smem:[#allocation20_spill]]  ;;  %s260_s19 = int_to_ptr.vmem [resolvable:$true] %s259_s19 }
  0x56   : > { %s1999_s11 = scalar_lea.hbm %s2614_s6, 8192 }
  0x57   : > { %p2000_p1 = scmp.ne.s32.totalorder %s2614_s6, %s1999_s11  ;;  %p2006_p6 = scmp.lt.u32.totalorder %s1999_s11, %s2614_s6 }
  0x59   : > { %p2002_p2 = pnand %p2000_p1, %p2282_p12 }
  0x5b   : > { %p2003_p4 = pneg %p2002_p2 }
  0x5d   : > { %p2008_p8 = pnand %p2006_p6, %p2003_p4 }
  0x5f   : > { %2011 = shalt.err (!%p2008_p8)
}
  0x60   : > { %s2012_s14 = scalar_lea.vmem %s260_s19, 8192  ;;  %p2020_p3 = scmp.lt.s32.totalorder %s260_s19, %s260_s19 }
  0x61   : > { %p2013_p11 = scmp.ne.s32.totalorder %s260_s19, %s2012_s14  ;;  %p2021_p5 = scmp.lt.s32.totalorder %s2012_s14, %s2012_s14 }
  0x63   : > { %p2015_p13 = pnand %p2013_p11, %p2282_p12  ;;  %p2022_p7 = por %p2021_p5, %p2020_p3 }
  0x65   : > { %p2016_p0 = pneg %p2015_p13 }
  0x67   : > { %p2023_p9 = pnand %p2022_p7, %p2016_p0 }
  0x69   : > { %2026 = shalt.err (!%p2023_p9)
}
  0x6a   : > { %s2615_s29 = smov 8   ;;  %s2616_s10 = smov 128  }
  0x6b   : > { %1881 = dma.hbm_to_vmem [thread:$0]  (!%p2268_p10), %s2614_s6, 8192, %s260_s19, [#allocation9], %s2616_s10, %s2616_s10, %s2615_s29  }
  0x6c   : > { %s31_s20 = ssub.s32 %s2165_s27, %s2325_s21  ;;  %s34_s12 = sadd.s32 1, %s2161_s26 }
  0x6d   : > { %p32_p12 = scmp.eq.s32.totalorder %s31_s20, 0  ;;  %p41_p1 = scmp.ne.s32.totalorder %s2161_s26, %s2157_s25 }
  0x6e   : > { %p42_p2 = scmp.eq.s32.totalorder %s2165_s27, 0  ;;  %p1896_p4 = scmp.lt.s32.totalorder %s2165_s27, 4 }
  0x6f   : > { %s2356_s13 = scalar_select %p32_p12, %s2161_s26, %s34_s12  }
  0x70   : > { %p43_p6 = por %p42_p2, %p41_p1  ;;  %p2617_p8 = scmp.eq.s32.totalorder %s2241_s28, 3 }
  0x71   : > { %s273_s16 = sand.u32 1, %s2161_s26   ;;  %s1334_s17 = sshll.u32 %s2165_s27, 7 }
  0x72   : > { %p2360_p11 = por %p2617_p8, %p41_p1  ;;  %s2366_s18 = sshll.u32 %s273_s16, 3 }
  0x73   : > { %s2371_s23 = scalar_lea.hbm %s2588_s0, %s1334_s17  ;;  %s277_s11 = scalar_lea.vmem [#allocation2], %s2366_s18 }
  0x74   : > { %s2618_s15 = scalar_select %p2360_p11, 1, 0 }
  0x75   : > { %s284_s14 = sshll.u32 %s277_s11, 4  ;;  %p2374_p10 = pnand %p1896_p4, %p43_p6  ;;  %s2378_s14 = int_to_ptr.vmem [resolvable:$true] %s284_s14 }
  0x76   : > { %s2383_s8 = scalar_lea.hbm %s2589_s1, %s1334_s17  ;;  %s274_s20 = scalar_lea.sflag [#allocation3], %s273_s16 }
  0x77   : > { %s2027_s12 = scalar_lea.hbm %s2371_s23, 128  ;;  %p2029_p0 = pneg %p2374_p10 }
  0x78   : > { %p2028_p13 = scmp.ne.s32.totalorder %s2371_s23, %s2027_s12  ;;  %s2032_s11 = scalar_lea.hbm %s2588_s0, 512 }
  0x79   : > { %p2033_p7 = scmp.lt.u32.totalorder %s2371_s23, %s2588_s0  ;;  %p2034_p9 = scmp.lt.u32.totalorder %s2032_s11, %s2027_s12 }
  0x7a   : > { %p2030_p3 = pnand %p2029_p0, %p2028_p13  ;;  %p2036_p1 = scmp.lt.u32.totalorder %s2027_s12, %s2371_s23 }
  0x7b   : > { %p2035_p12 = por %p2034_p9, %p2033_p7 }
  0x7c   : > { %p2031_p5 = pneg %p2030_p3 }
  0x7d   : > { %p2037_p2 = por %p2036_p1, %p2035_p12 }
  0x7f   : > { %p2038_p4 = pnand %p2037_p2, %p2031_p5 }
  0x81   : > { %2041 = shalt.err (!%p2038_p4)
}
  0x82   : > { %s2042_s16 = scalar_lea.vmem %s2378_s14, 128  ;;  %s2174_s17 = smov [#allocation2]  }
  0x83   : > { %p2043_p6 = scmp.ne.s32.totalorder %s2378_s14, %s2042_s16  ;;  %s2047_s10 = sshll.u32 %s2174_s17, 4  ;;  %s2048_s10 = int_to_ptr.vmem [resolvable:$false] %s2047_s10 }
  0x84   : > { %s2049_s4 = scalar_lea.vmem %s2048_s10, 256  ;;  %p2050_p3 = scmp.lt.s32.totalorder %s2378_s14, %s2048_s10 }
  0x85   : > { %p2045_p8 = pnand %p2043_p6, %p2029_p0  ;;  %p2051_p7 = scmp.lt.s32.totalorder %s2049_s4, %s2042_s16 }
  0x87   : > { %p2046_p13 = pneg %p2045_p8  ;;  %p2052_p9 = por %p2051_p7, %p2050_p3 }
  0x89   : > { %p2053_p12 = pnand %p2052_p9, %p2046_p13 }
  0x8b   : > { %2056 = shalt.err (!%p2053_p12)
}
  0x8c   : > { %1885 = dma.hbm_to_vmem [thread:$0]  (!%p2374_p10), %s2371_s23, 128, %s2378_s14, %s274_s20  }
  0x8d   : > { %s291_s6 = sand.u32 1, %s2165_s27   ;;  %s295_s2 = scalar_lea.vmem [#allocation5], %s2366_s18 }
  0x8e   : > { %s302_s12 = sshll.u32 %s295_s2, 4  ;;  %s292_s22 = scalar_lea.sflag [#allocation6], %s291_s6  ;;  %s303_s12 = int_to_ptr.vmem [resolvable:$true] %s302_s12 }
  0x8f   : > { %s2057_s19 = scalar_lea.hbm %s2383_s8, 128  ;;  %s2062_s17 = scalar_lea.hbm %s2589_s1, 512 }
  0x90   : > { %p2058_p5 = scmp.ne.s32.totalorder %s2383_s8, %s2057_s19  ;;  %p2063_p4 = scmp.lt.u32.totalorder %s2383_s8, %s2589_s1 }
  0x91   : > { %p2064_p6 = scmp.lt.u32.totalorder %s2062_s17, %s2057_s19  ;;  %p2066_p13 = scmp.lt.u32.totalorder %s2057_s19, %s2383_s8 }
  0x92   : > { %p2060_p1 = pnand %p2058_p5, %p2029_p0 }
  0x93   : > { %p2065_p8 = por %p2064_p6, %p2063_p4 }
  0x94   : > { %p2061_p2 = pneg %p2060_p1 }
  0x95   : > { %p2067_p3 = por %p2066_p13, %p2065_p8 }
  0x97   : > { %p2068_p7 = pnand %p2067_p3, %p2061_p2 }
  0x99   : > { %2071 = shalt.err (!%p2068_p7)
}
  0x9a   : > { %s2072_s18 = scalar_lea.vmem %s303_s12, 128  ;;  %s2175_s23 = smov [#allocation5]  }
  0x9b   : > { %p2073_p9 = scmp.ne.s32.totalorder %s303_s12, %s2072_s18  ;;  %s2077_s14 = sshll.u32 %s2175_s23, 4  ;;  %s2078_s14 = int_to_ptr.vmem [resolvable:$false] %s2077_s14 }
  0x9c   : > { %s2079_s20 = scalar_lea.vmem %s2078_s14, 256  ;;  %p2080_p1 = scmp.lt.s32.totalorder %s303_s12, %s2078_s14 }
  0x9d   : > { %p2075_p12 = pnand %p2073_p9, %p2029_p0  ;;  %p2081_p11 = scmp.lt.s32.totalorder %s2079_s20, %s2072_s18 }
  0x9f   : > { %p2076_p5 = pneg %p2075_p12  ;;  %p2082_p4 = por %p2081_p11, %p2080_p1 }
  0xa1   : > { %p2083_p6 = pnand %p2082_p4, %p2076_p5 }
  0xa3   : > { %2086 = shalt.err (!%p2083_p6)
}
  0xa4   : > { %1888 = dma.hbm_to_vmem [thread:$0]  (!%p2374_p10), %s2383_s8, 128, %s303_s12, %s292_s22  }
  0xa5   : > { %p2620_p2 = scmp.ne.s32.totalorder %s2609_s9, 0 }
  0xa6   : > { %s2434_s6 = sand.u32 (!%p2620_p2), 1, %s2157_s25   ;;  %p2621_p11 = scmp.ne.s32.totalorder (!%p2620_p2), %s2606_s30, 0 }
  0xa7   : > { %311 = sbr.rel (%p2620_p2) target bundleno = 1320 (0x528), region = 48  ;;  %s2437_s2 = sshll.u32 (!%p2620_p2), %s2434_s6, 3 }
  0xa8   : > { %s314_s19 = scalar_lea.sflag (!%p2620_p2), [#allocation3], %s2434_s6  ;;  %s317_s11 = scalar_lea.vmem (!%p2620_p2), [#allocation2], %s2437_s2 }
  0xae   : > { %2132 = dma.done.wait (%p2621_p11), %s314_s19, 128  }
  0xaf   : > { %2134 = vsyncadd (%p2621_p11), %s314_s19, 4294967168  ;;  %s322_s9 = sand.u32 1, %s2241_s28   ;;  %s326_s8 = scalar_lea.vmem [#allocation5], %s2437_s2 }
  0xb0   : > { %s323_s29 = scalar_lea.sflag [#allocation6], %s322_s9 }
  0xb1   : > { %2136 = dma.done.wait (%p2621_p11), %s323_s29, 128  }
  0xb2   : > { %2138 = vsyncadd (%p2621_p11), %s323_s29, 4294967168  ;;  %p2622_p10 = scmp.eq.s32.totalorder %s2241_s28, 0 }
  0xb4   : > { %2140 = dma.done.wait (%p2622_p10), [#allocation6], 4096   ;;  %p2623_p0 = pmov %p2622_p10 }
  0xb6   : > { %2142 = vsyncadd (%p2623_p0), [#allocation6], 4294963200  ;;  %p2624_p8 = pmov %p2623_p0 }
  0xb7   : > { %p2625_p13 = pmov %p2623_p0 }
  0xb8   : > { %2144 = dma.done.wait (%p2624_p8), [#allocation9], 20480  }
  0xb9   : > { %2146 = vsyncadd (%p2625_p13), [#allocation9], 4294946816  ;;  %v2176_v0 = vmov 0.0|0.0   ;;  %vm2177_vm0 = vmmov 0   ;;  %v2178_v1 = vmov 0.0   ;;  %v376_v2 = vld [vmem:[#allocation7] sm:$0xff] }
  0xba   : > { %1630 = vmatprep.subr.bf16.mxu0 %v2176_v0  ;;  %1522 = vmatprep.mubr.msk.f32.mxu0 %vm2177_vm0, %v2178_v1  ;;  %v377_v3 = vld [vmem:[#allocation7 + $0x8] sm:$0xff]  ;;  %v378_v4 = vld [vmem:[#allocation7 + $0x10] sm:$0xff]  ;;  %v379_v6 = vld [vmem:[#allocation7 + $0x18] sm:$0xff]  ;;  %s1349_s23 = sshll.u32 %s2241_s28, 7  ;;  %s373_s14 = scalar_lea.vmem [#allocation11], %s2437_s2 }
  0xbb   : > { %1654 = vmatprep.subr.bf16.mxu1 %v2176_v0  ;;  %1557 = vmatprep.mubr.msk.f32.mxu1 %vm2177_vm0, %v2178_v1  ;;  %v1631_v5 = vpack.c.bf16 %v377_v3, %v376_v2  ;;  %v1634_v7 = vpack.c.bf16 %v379_v6, %v378_v4  ;;  %v380_v8 = vld [vmem:[#allocation7 + $0x20] sm:$0xff]  ;;  %v381_v9 = vld [vmem:[#allocation7 + $0x28] sm:$0xff]  ;;  %v473_v12 = vld [vmem:[#allocation7 + $0x90] sm:$0xff]  ;;  %s1206_s20 = sshll.u32 %s373_s14, 4  ;;  %s2545_s9 = scalar_lea.hbm %s2595_s7, %s1349_s23  ;;  %s2547_s20 = int_to_ptr.vmem [resolvable:$true] %s1206_s20 }
  0xbc   : > { %v471_v10 = vld [vmem:[#allocation7 + $0x80] sm:$0xff]  ;;  %v472_v11 = vld [vmem:[#allocation7 + $0x88] sm:$0xff]  ;;  %v474_v13 = vld [vmem:[#allocation7 + $0x98] sm:$0xff]  ;;  %v1637_v14 = vpack.c.bf16 %v381_v9, %v380_v8  ;;  %s1193_s29 = scalar_lea.sflag [#allocation4], %s2434_s6  ;;  %p2626_p7 = scmp.ne.s32.totalorder %s2618_s15, 0 }
  0xbd   : > { %1632 = vmatpush3.bf16.msra.mxu0 %v1631_v5  ;;  %v1655_v15 = vpack.c.bf16 %v472_v11, %v471_v10  ;;  %v382_v16 = vld [vmem:[#allocation7 + $0x30] sm:$0xff]  ;;  %v383_v17 = vld [vmem:[#allocation7 + $0x38] sm:$0xff]  ;;  %v1658_v18 = vpack.c.bf16 %v474_v13, %v473_v12  ;;  %v475_v19 = vld [vmem:[#allocation7 + $0xa0] sm:$0xff]  ;;  %s2179_s28 = smov [#allocation11]  }
  0xbe   : > { %1633 = vmatprep.subr.bf16.mxu0 %v2176_v0  ;;  %v476_v20 = vld [vmem:[#allocation7 + $0xa8] sm:$0xff]  ;;  %v1640_v21 = vpack.c.bf16 %v383_v17, %v382_v16  ;;  %v384_v22 = vld [vmem:[#allocation7 + $0x40] sm:$0xff]  ;;  %v477_v25 = vld [vmem:[#allocation7 + $0xb0] sm:$0xff]  ;;  %s2091_s2 = sshll.u32 %s2179_s28, 4  ;;  %s2092_s2 = int_to_ptr.vmem [resolvable:$false] %s2091_s2 }
  0xbf   : > { %1656 = vmatpush3.bf16.msra.mxu1 %v1655_v15  ;;  %v385_v23 = vld [vmem:[#allocation7 + $0x48] sm:$0xff]  ;;  %v1661_v24 = vpack.c.bf16 %v476_v20, %v475_v19  ;;  %v478_v26 = vld [vmem:[#allocation7 + $0xb8] sm:$0xff]  ;;  %v386_v28 = vld [vmem:[#allocation7 + $0x50] sm:$0xff]  ;;  %s2093_s30 = scalar_lea.vmem %s2092_s2, 256  ;;  %p2094_p5 = scmp.lt.s32.totalorder %s2547_s20, %s2092_s2 }
  0xc0   : > { %1657 = vmatprep.subr.bf16.mxu1 %v2176_v0  ;;  %v1643_v27 = vpack.c.bf16 %v385_v23, %v384_v22  ;;  %v387_v29 = vld [vmem:[#allocation7 + $0x58] sm:$0xff]  ;;  %v1664_v30 = vpack.c.bf16 %v478_v26, %v477_v25  ;;  %v479_v31 = vld [vmem:[#allocation7 + $0xc0] sm:$0xff]  ;;  %v480_v32 = vld [vmem:[#allocation7 + $0xc8] sm:$0xff] }
  0xc1   : > { %1635 = vmatpush3.bf16.msra.mxu0 %v1634_v7  ;;  %v1646_v33 = vpack.c.bf16 %v387_v29, %v386_v28  ;;  %v388_v34 = vld [vmem:[#allocation7 + $0x60] sm:$0xff]  ;;  %v389_v35 = vld [vmem:[#allocation7 + $0x68] sm:$0xff]  ;;  %v1667_v36 = vpack.c.bf16 %v480_v32, %v479_v31  ;;  %v481_v37 = vld [vmem:[#allocation7 + $0xd0] sm:$0xff] }
  0xc2   : > { %1636 = vmatprep.subr.bf16.mxu0 %v2176_v0  ;;  %v482_v38 = vld [vmem:[#allocation7 + $0xd8] sm:$0xff]  ;;  %v1649_v39 = vpack.c.bf16 %v389_v35, %v388_v34  ;;  %v390_v40 = vld [vmem:[#allocation7 + $0x70] sm:$0xff]  ;;  %v483_v43 = vld [vmem:[#allocation7 + $0xe0] sm:$0xff] }
  0xc3   : > { %1659 = vmatpush3.bf16.msra.mxu1 %v1658_v18  ;;  %v391_v41 = vld [vmem:[#allocation7 + $0x78] sm:$0xff]  ;;  %v1670_v42 = vpack.c.bf16 %v482_v38, %v481_v37  ;;  %v484_v44 = vld [vmem:[#allocation7 + $0xe8] sm:$0xff]  ;;  %v485_v48 = vld [vmem:[#allocation7 + $0xf0] sm:$0xff] }
  0xc4   : > { %1660 = vmatprep.subr.bf16.mxu1 %v2176_v0  ;;  %v1652_v45 = vpack.c.bf16 %v391_v41, %v390_v40  ;;  %v1673_v46 = vpack.c.bf16 %v484_v44, %v483_v43  ;;  %v375_v47 = vld [vmem:[%s326_s8] sm:$0xff]  ;;  %v566_v51 = vld [vmem:[#allocation8 + $0x8] sm:$0xff]  ;;  %v569_v52 = vld [vmem:[#allocation8 + $0x20] sm:$0xff]  ;;  %s2087_s8 = scalar_lea.vmem %s2547_s20, 128 }
  0xc5   : > { %1638 = vmatpush3.bf16.msra.mxu0 %v1637_v14  ;;  %v486_v49 = vld [vmem:[#allocation7 + $0xf8] sm:$0xff]  ;;  %v1678_v53 = vpack.c.bf16 %v569_v52, %v566_v51  ;;  %v565_v54 = vld [vmem:[#allocation8] sm:$0xff]  ;;  %v575_v58 = vld [vmem:[#allocation8 + $0x50] sm:$0xff]  ;;  %p2088_p3 = scmp.ne.s32.totalorder %s2547_s20, %s2087_s8  ;;  %p2095_p1 = scmp.lt.s32.totalorder %s2093_s30, %s2087_s8 }
  0xc6   : > { %1639 = vmatprep.subr.bf16.mxu0 %v2176_v0  ;;  %v1676_v50 = vpack.c.bf16 %v486_v49, %v485_v48  ;;  %v568_v55 = vld [vmem:[#allocation8 + $0x18] sm:$0xff]  ;;  %v571_v60 = vld [vmem:[#allocation8 + $0x30] sm:$0xff]  ;;  %v574_v61 = vld [vmem:[#allocation8 + $0x48] sm:$0xff] }
  0xc7   : > { %1662 = vmatpush3.bf16.msra.mxu1 %v1661_v24  ;;  %v1680_v56 = vpack.c.bf16 %v568_v55, %v565_v54  ;;  %v572_v57 = vld [vmem:[#allocation8 + $0x38] sm:$0xff]  ;;  %v1684_v62 = vpack.c.bf16 %v574_v61, %v571_v60  ;;  %v578_v63 = vld [vmem:[#allocation8 + $0x68] sm:$0xff]  ;;  %v581_v2 = vld [vmem:[#allocation8 + $0x80] sm:$0xff]  ;;  %p2089_p9 = pnand %p2088_p3, %p2626_p7  ;;  %p2096_p4 = por %p2095_p1, %p2094_p5 }
  0xc8   : > { %1663 = vmatprep.subr.bf16.mxu1 %v2176_v0  ;;  %v1682_v59 = vpack.c.bf16 %v575_v58, %v572_v57  ;;  %v1686_v3 = vpack.c.bf16 %v581_v2, %v578_v63  ;;  %v577_v4 = vld [vmem:[#allocation8 + $0x60] sm:$0xff]  ;;  %v580_v5 = vld [vmem:[#allocation8 + $0x78] sm:$0xff]  ;;  %v587_v8 = vld [vmem:[#allocation8 + $0xb0] sm:$0xff] }
  0xc9   : > { %1641 = vmatpush3.bf16.msra.mxu0 %v1640_v21  ;;  %v1688_v6 = vpack.c.bf16 %v580_v5, %v577_v4  ;;  %v584_v7 = vld [vmem:[#allocation8 + $0x98] sm:$0xff]  ;;  %v583_v10 = vld [vmem:[#allocation8 + $0x90] sm:$0xff]  ;;  %v586_v11 = vld [vmem:[#allocation8 + $0xa8] sm:$0xff]  ;;  %p2090_p12 = pneg %p2089_p9 }
  0xca   : > { %1642 = vmatprep.subr.bf16.mxu0 %v2176_v0  ;;  %v1690_v9 = vpack.c.bf16 %v587_v8, %v584_v7  ;;  %v1692_v12 = vpack.c.bf16 %v586_v11, %v583_v10  ;;  %v590_v13 = vld [vmem:[#allocation8 + $0xc8] sm:$0xff]  ;;  %v593_v14 = vld [vmem:[#allocation8 + $0xe0] sm:$0xff]  ;;  %v592_v17 = vld [vmem:[#allocation8 + $0xd8] sm:$0xff] }
  0xcb   : > { %1665 = vmatpush3.bf16.msra.mxu1 %v1664_v30  ;;  %v1694_v15 = vpack.c.bf16 %v593_v14, %v590_v13  ;;  %v589_v16 = vld [vmem:[#allocation8 + $0xc0] sm:$0xff]  ;;  %v596_v19 = vld [vmem:[#allocation8 + $0xf8] sm:$0xff]  ;;  %v599_v20 = vld [vmem:[#allocation8 + $0x110] sm:$0xff]  ;;  %p2097_p6 = pnand %p2096_p4, %p2090_p12 }
  0xcc   : > { %1666 = vmatprep.subr.bf16.mxu1 %v2176_v0  ;;  %v1696_v18 = vpack.c.bf16 %v592_v17, %v589_v16  ;;  %v1698_v21 = vpack.c.bf16 %v599_v20, %v596_v19  ;;  %v595_v22 = vld [vmem:[#allocation8 + $0xf0] sm:$0xff]  ;;  %v598_v23 = vld [vmem:[#allocation8 + $0x108] sm:$0xff]  ;;  %v605_v26 = vld [vmem:[#allocation8 + $0x140] sm:$0xff] }
  0xcd   : > { %1644 = vmatpush3.bf16.msra.mxu0 %v1643_v27  ;;  %v1700_v24 = vpack.c.bf16 %v598_v23, %v595_v22  ;;  %v602_v25 = vld [vmem:[#allocation8 + $0x128] sm:$0xff]  ;;  %v601_v28 = vld [vmem:[#allocation8 + $0x120] sm:$0xff]  ;;  %v604_v29 = vld [vmem:[#allocation8 + $0x138] sm:$0xff] }
  0xce   : > { %1645 = vmatprep.subr.bf16.mxu0 %v2176_v0  ;;  %v1702_v27 = vpack.c.bf16 %v605_v26, %v602_v25  ;;  %v1704_v30 = vpack.c.bf16 %v604_v29, %v601_v28  ;;  %v608_v31 = vld [vmem:[#allocation8 + $0x158] sm:$0xff]  ;;  %v611_v32 = vld [vmem:[#allocation8 + $0x170] sm:$0xff]  ;;  %v1344_v34 = vld [vmem:[%s2591_s3] ss:$0 sm:$0xff] }
  0xcf   : > { %1668 = vmatpush3.bf16.msra.mxu1 %v1667_v36  ;;  %v567_v35 = vld [vmem:[#allocation8 + $0x10] sm:$0xff]  ;;  %v570_v36 = vld [vmem:[#allocation8 + $0x28] sm:$0xff]  ;;  %v576_v43 = vld [vmem:[#allocation8 + $0x58] sm:$0xff] }
  0xd0   : > { %1669 = vmatprep.subr.bf16.mxu1 %v2176_v0  ;;  %v1711_v40 = vpack.c.bf16 %v570_v36, %v567_v35  ;;  %v585_v48 = vld [vmem:[#allocation8 + $0xa0] sm:$0xff]  ;;  %v588_v49 = vld [vmem:[#allocation8 + $0xb8] sm:$0xff]  ;;  %v591_v51 = vld [vmem:[#allocation8 + $0xd0] sm:$0xff] }
  0xd1   : > { %1647 = vmatpush3.bf16.msra.mxu0 %v1646_v33  ;;  %v1706_v33 = vpack.c.bf16 %v611_v32, %v608_v31  ;;  %v594_v52 = vld [vmem:[#allocation8 + $0xe8] sm:$0xff]  ;;  %v597_v54 = vld [vmem:[#allocation8 + $0x100] sm:$0xff]  ;;  %v600_v55 = vld [vmem:[#allocation8 + $0x118] sm:$0xff] }
  0xd2   : > { %1648 = vmatprep.subr.bf16.mxu0 %v2176_v0  ;;  %v603_v57 = vld [vmem:[#allocation8 + $0x130] sm:$0xff]  ;;  %v606_v58 = vld [vmem:[#allocation8 + $0x148] sm:$0xff]  ;;  %v609_v60 = vld [vmem:[#allocation8 + $0x160] sm:$0xff] }
  0xd3   : > { %1671 = vmatpush3.bf16.msra.mxu1 %v1670_v42  ;;  %v573_v42 = vld [vmem:[#allocation8 + $0x40] sm:$0xff]  ;;  %v612_v61 = vld [vmem:[#allocation8 + $0x178] sm:$0xff]  ;;  %v607_v63 = vld [vmem:[#allocation8 + $0x150] sm:$0xff] }
  0xd4   : > { %1672 = vmatprep.subr.bf16.mxu1 %v2176_v0  ;;  %v1714_v44 = vpack.c.bf16 %v576_v43, %v573_v42  ;;  %v610_v2 = vld [vmem:[#allocation8 + $0x168] sm:$0xff]  ;;  %v882_v5 = vld [vmem:[#allocation8 + $0x1a0] sm:$0xff]  ;;  %v885_v13 = vld [vmem:[#allocation8 + $0x1b8] sm:$0xff] }
  0xd5   : > { %1650 = vmatpush3.bf16.msra.mxu0 %v1649_v39  ;;  %v879_v4 = vld [vmem:[#allocation8 + $0x188] sm:$0xff]  ;;  %v790_v7 = vld [vmem:[#allocation10 + $0x80] sm:$0xff]  ;;  %v888_v14 = vld [vmem:[#allocation8 + $0x1d0] sm:$0xff] }
  0xd6   : > { %1651 = vmatprep.subr.bf16.mxu0 %v2176_v0  ;;  %v791_v8 = vld [vmem:[#allocation10 + $0x88] sm:$0xff]  ;;  %v1346_v10 = vld [vmem:[%s2591_s3 + $0x1] ss:$0 sm:$0xff]  ;;  %v792_v17 = vld [vmem:[#allocation10 + $0x90] sm:$0xff]  ;;  %v1770_v23 = vpack.c.bf16 %v888_v14, %v885_v13 }
  0xd7   : > { %1674 = vmatpush3.bf16.msra.mxu1 %v1673_v46  ;;  %v582_v46 = vld [vmem:[#allocation8 + $0x88] sm:$0xff]  ;;  %v878_v11 = vld [vmem:[#allocation8 + $0x180] sm:$0xff]  ;;  %v777_v31 = vld [vmem:[#allocation10 + $0x18] sm:$0xff] }
  0xd8   : > { %1675 = vmatprep.subr.bf16.mxu1 %v2176_v0  ;;  %v775_v16 = vld [vmem:[#allocation10 + $0x8] sm:$0xff]  ;;  %v894_v28 = vld [vmem:[#allocation8 + $0x200] sm:$0xff] }
  0xd9   : > { %1653 = vmatpush3.bf16.msra.mxu0 %v1652_v45  ;;  %v579_v45 = vld [vmem:[#allocation8 + $0x70] sm:$0xff]  ;;  %v887_v25 = vld [vmem:[#allocation8 + $0x1c8] sm:$0xff]  ;;  %v794_v32 = vld [vmem:[#allocation10 + $0xa0] sm:$0xff] }
  0xda   : > { %1679 = vmatprep.subr.bf16.mxu0 %v1678_v53  ;;  %v1723_v53 = vpack.c.bf16 %v594_v52, %v591_v51  ;;  %v891_v26 = vld [vmem:[#allocation8 + $0x1e8] sm:$0xff]  ;;  %v890_v36 = vld [vmem:[#allocation8 + $0x1e0] sm:$0xff] }
  0xdb   : > { %1677 = vmatpush3.bf16.msra.mxu1 %v1676_v50  ;;  %v1720_v50 = vpack.c.bf16 %v588_v49, %v585_v48  ;;  %v1774_v35 = vpack.c.bf16 %v894_v28, %v891_v26  ;;  %v778_v42 = vld [vmem:[#allocation10 + $0x20] sm:$0xff]  ;;  %v779_v43 = vld [vmem:[#allocation10 + $0x28] sm:$0xff]  ;;  %v896_v48 = vld [vmem:[#allocation8 + $0x210] sm:$0xff] }
  0xdc   : > { %1523 = vmatmul.mubr.f32.vlgmr.msra.gmra.mrb[0].mxu0 %v375_v47  ;;  %1710 = vmatprep.subr.bf16.mxu1 %v2176_v0  ;;  %v1717_v47 = vpack.c.bf16 %v582_v46, %v579_v45  ;;  %v797_v45 = vld [vmem:[#allocation10 + $0xb8] sm:$0xff]  ;;  %v899_v49 = vld [vmem:[#allocation8 + $0x228] sm:$0xff]  ;;  %v1744_v51 = vpack.c.bf16 %v779_v43, %v778_v42  ;;  %v906_v52 = vld [vmem:[#allocation8 + $0x260] sm:$0xff] }
  0xdd   : > { %694 = vmatprep.mubr.f32.mxu0 %v2178_v1  ;;  %1681 = vmatpush1.bf16.msra.mxu0 %v1680_v56  ;;  %v1726_v56 = vpack.c.bf16 %v600_v55, %v597_v54  ;;  %v780_v54 = vld [vmem:[#allocation10 + $0x30] sm:$0xff]  ;;  %v781_v55 = vld [vmem:[#allocation10 + $0x38] sm:$0xff]  ;;  %v918_v14 = vld [vmem:[#allocation8 + $0x2c0] sm:$0xff] }
  0xde   : > { %1683 = vmatprep.subr.bf16.mxu0 %v1682_v59  ;;  %v1729_v59 = vpack.c.bf16 %v606_v58, %v603_v57  ;;  %v799_v57 = vld [vmem:[#allocation10 + $0xc8] sm:$0xff]  ;;  %v1780_v58 = vpack.c.bf16 %v899_v49, %v896_v48  ;;  %v1105_v43 = vld [vmem:[#allocation10 + $0x180] sm:$0xff]  ;;  %v1107_v48 = vld [vmem:[#allocation10 + $0x190] sm:$0xff] }
  0xdf   : > { %v1108_v49 = vld [vmem:[#allocation10 + $0x198] sm:$0xff] }
  0xe1   : > { %1685 = vmatpush1.bf16.msra.mxu0 %v1684_v62  ;;  %v1732_v62 = vpack.c.bf16 %v612_v61, %v609_v60  ;;  %v902_v60 = vld [vmem:[#allocation8 + $0x240] sm:$0xff]  ;;  %v905_v61 = vld [vmem:[#allocation8 + $0x258] sm:$0xff] }
  0xe2   : > { %1687 = vmatprep.subr.bf16.mxu0 %v1686_v3  ;;  %v1708_v3 = vpack.c.bf16 %v610_v2, %v607_v63  ;;  %v1748_v63 = vpack.c.bf16 %v781_v55, %v780_v54  ;;  %v912_v2 = vld [vmem:[#allocation8 + $0x290] sm:$0xff]  ;;  %v1109_v54 = vld [vmem:[#allocation10 + $0x1a0] sm:$0xff]  ;;  %v1110_v55 = vld [vmem:[#allocation10 + $0x1a8] sm:$0xff] }
  0xe5   : > { %1689 = vmatpush1.bf16.msra.mxu0 %v1688_v6  ;;  %v1766_v6 = vpack.c.bf16 %v882_v5, %v879_v4  ;;  %v782_v4 = vld [vmem:[#allocation10 + $0x40] sm:$0xff]  ;;  %v783_v5 = vld [vmem:[#allocation10 + $0x48] sm:$0xff] }
  0xe6   : > { %1691 = vmatprep.subr.bf16.mxu0 %v1690_v9  ;;  %v1734_v9 = vpack.c.bf16 %v791_v8, %v790_v7  ;;  %v801_v7 = vld [vmem:[#allocation10 + $0xd8] sm:$0xff]  ;;  %v1784_v8 = vpack.c.bf16 %v905_v61, %v902_v60  ;;  %v1752_v13 = vpack.c.bf16 %v783_v5, %v782_v4  ;;  %v1111_v60 = vld [vmem:[#allocation10 + $0x1b0] sm:$0xff]  ;;  %v1113_v4 = vld [vmem:[#allocation10 + $0x1c0] sm:$0xff] }
  0xe7   : > { %v1112_v61 = vld [vmem:[#allocation10 + $0x1b8] sm:$0xff]  ;;  %v1114_v5 = vld [vmem:[#allocation10 + $0x1c8] sm:$0xff] }
  0xe9   : > { %1693 = vmatpush1.bf16.msra.mxu0 %v1692_v12  ;;  %v881_v12 = vld [vmem:[#allocation8 + $0x198] sm:$0xff] }
  0xea   : > { %1695 = vmatprep.subr.bf16.mxu0 %v1694_v15  ;;  %v774_v15 = vld [vmem:[#allocation10] sm:$0xff]  ;;  %v1768_v20 = vpack.c.bf16 %v881_v12, %v878_v11  ;;  %v911_v11 = vld [vmem:[#allocation8 + $0x288] sm:$0xff] }
  0xeb   : > { %v915_v12 = vld [vmem:[#allocation8 + $0x2a8] sm:$0xff] }
  0xed   : > { %1697 = vmatpush1.bf16.msra.mxu0 %v1696_v18  ;;  %v793_v18 = vld [vmem:[#allocation10 + $0x98] sm:$0xff] }
  0xee   : > { %1699 = vmatprep.subr.bf16.mxu0 %v1698_v21  ;;  %v1738_v29 = vpack.c.bf16 %v793_v18, %v792_v17  ;;  %v785_v17 = vld [vmem:[#allocation10 + $0x58] sm:$0xff]  ;;  %v802_v18 = vld [vmem:[#allocation10 + $0xe0] sm:$0xff] }
  0xf1   : > { %1701 = vmatpush1.bf16.msra.mxu0 %v1700_v24  ;;  %v884_v24 = vld [vmem:[#allocation8 + $0x1b0] sm:$0xff] }
  0xf2   : > { %1703 = vmatprep.subr.bf16.mxu0 %v1702_v27  ;;  %v1736_v27 = vpack.c.bf16 %v775_v16, %v774_v15  ;;  %v784_v16 = vld [vmem:[#allocation10 + $0x50] sm:$0xff] }
  0xf3   : > { %v1756_v26 = vpack.c.bf16 %v785_v17, %v784_v16  ;;  %v615_v17 = vlaneseq }
  0xf5   : > { %1705 = vmatpush1.bf16.msra.mxu0 %v1704_v30  ;;  %v776_v30 = vld [vmem:[#allocation10 + $0x10] sm:$0xff] }
  0xf6   : > { %1707 = vmatprep.subr.bf16.mxu0 %v1706_v33  ;;  %v795_v33 = vld [vmem:[#allocation10 + $0xa8] sm:$0xff] }
  0xf9   : > { %1709 = vmatpush1.bf16.msra.mxu0 %v1708_v3 }
  0xfa   : > { %1735 = vmatprep.subr.bf16.mxu0 %v1734_v9 }
 0x1af   : > { %v465_v37 = vpop.f32.mrb[0].mxu0 }
 0x1b0   : > { %v466_v38 = vadd.f32 %v1344_v34, %v465_v37  ;;  %v1524_v39 = vpop.f32.mrb[1].mxu0  ;;  %v1772_v34 = vpack.c.bf16 %v887_v25, %v884_v24  ;;  %v893_v37 = vld [vmem:[#allocation8 + $0x1f8] sm:$0xff] }
 0x1b1   : > { %v1740_v39 = vpack.c.bf16 %v777_v31, %v776_v30  ;;  %v1776_v46 = vpack.c.bf16 %v893_v37, %v890_v36  ;;  %v917_v24 = vld [vmem:[#allocation8 + $0x2b8] sm:$0xff]  ;;  %v787_v30 = vld [vmem:[#allocation10 + $0x68] sm:$0xff]  ;;  %v804_v37 = vld [vmem:[#allocation10 + $0xf0] sm:$0xff] }
 0x1b2   : > { %v469_v41 = vmax.f32 %v466_v38, 0.0  ;;  %v897_v38 = vld [vmem:[#allocation8 + $0x218] sm:$0xff] }
 0x1b3   : > { %v921_v25 = vld [vmem:[#allocation8 + $0x2d8] sm:$0xff] }
 0x1b4   : > { %1558 = vmatmul.mubr.f32.vlgmr.msra.gmra.mrb[0].mxu1 %v469_v41  ;;  %v1742_v41 = vpack.c.bf16 %v795_v33, %v794_v32  ;;  %v920_v33 = vld [vmem:[#allocation8 + $0x2d0] sm:$0xff] }
 0x1b5   : > { %1712 = vmatpush3.bf16.msra.mxu1 %v1711_v40  ;;  %1592 = vmatprep.mubr.msk.f32.mxu1 %vm2177_vm0, %v2178_v1  ;;  %v900_v40 = vld [vmem:[#allocation8 + $0x230] sm:$0xff] }
 0x1b6   : > { %1713 = vmatprep.subr.bf16.mxu1 %v2176_v0 }
 0x1b9   : > { %1715 = vmatpush3.bf16.msra.mxu1 %v1714_v44  ;;  %v796_v44 = vld [vmem:[#allocation10 + $0xb0] sm:$0xff] }
 0x1ba   : > { %1716 = vmatprep.subr.bf16.mxu1 %v2176_v0 }
 0x1bd   : > { %1718 = vmatpush3.bf16.msra.mxu1 %v1717_v47  ;;  %v1778_v47 = vpack.c.bf16 %v900_v40, %v897_v38  ;;  %v805_v38 = vld [vmem:[#allocation10 + $0xf8] sm:$0xff]  ;;  %v788_v40 = vld [vmem:[#allocation10 + $0x70] sm:$0xff] }
 0x1be   : > { %1719 = vmatprep.subr.bf16.mxu1 %v2176_v0 }
 0x1c1   : > { %1721 = vmatpush3.bf16.msra.mxu1 %v1720_v50  ;;  %v903_v50 = vld [vmem:[#allocation8 + $0x248] sm:$0xff] }
 0x1c2   : > { %1722 = vmatprep.subr.bf16.mxu1 %v2176_v0 }
 0x1c5   : > { %1724 = vmatpush3.bf16.msra.mxu1 %v1723_v53  ;;  %v1746_v53 = vpack.c.bf16 %v797_v45, %v796_v44  ;;  %v1106_v44 = vld [vmem:[#allocation10 + $0x188] sm:$0xff]  ;;  %v1089_v45 = vld [vmem:[#allocation10 + $0x100] sm:$0xff] }
 0x1c6   : > { %1725 = vmatprep.subr.bf16.mxu1 %v2176_v0 }
 0x1c9   : > { %1727 = vmatpush3.bf16.msra.mxu1 %v1726_v56  ;;  %v798_v56 = vld [vmem:[#allocation10 + $0xc0] sm:$0xff] }
 0x1ca   : > { %1728 = vmatprep.subr.bf16.mxu1 %v2176_v0  ;;  %v1750_v3 = vpack.c.bf16 %v799_v57, %v798_v56  ;;  %v1830_v57 = vpack.c.bf16 %v1110_v55, %v1109_v54  ;;  %v1347_v54 = vld [vmem:[%s2593_s5 + $0x3] sm:$0x7] }
 0x1cd   : > { %1730 = vmatpush3.bf16.msra.mxu1 %v1729_v59  ;;  %v1782_v59 = vpack.c.bf16 %v906_v52, %v903_v50  ;;  %v1091_v52 = vld [vmem:[#allocation10 + $0x110] sm:$0xff] }
 0x1ce   : > { %1731 = vmatprep.subr.bf16.mxu1 %v2176_v0 }
 0x1d1   : > { %1733 = vmatpush3.bf16.msra.mxu1 %v1732_v62  ;;  %v909_v62 = vld [vmem:[#allocation8 + $0x278] sm:$0xff] }
 0x1d2   : > { %1767 = vmatprep.subr.bf16.mxu1 %v1766_v6  ;;  %v800_v6 = vld [vmem:[#allocation10 + $0xd0] sm:$0xff]  ;;  %v1786_v9 = vpack.c.bf16 %v912_v2, %v909_v62 }
 0x1d3   : > { %v1754_v15 = vpack.c.bf16 %v801_v7, %v800_v6  ;;  %v1095_v2 = vld [vmem:[#allocation10 + $0x130] sm:$0xff]  ;;  %v1838_v7 = vpack.c.bf16 %v1114_v5, %v1113_v4  ;;  %v1101_v5 = vld [vmem:[#allocation10 + $0x160] sm:$0xff] }
 0x287   : > { %v561_v19 = vpop.f32.mrb[0].mxu1 }
 0x288   : > { %v2498_v21 = vadd.f32 %v1346_v10, %v561_v19  ;;  %v1559_v22 = vpop.f32.mrb[1].mxu1  ;;  %v908_v10 = vld [vmem:[#allocation8 + $0x270] sm:$0xff]  ;;  %v803_v19 = vld [vmem:[#allocation10 + $0xe8] sm:$0xff] }
 0x289   : > { %v1790_v22 = vpack.c.bf16 %v918_v14, %v915_v12  ;;  %v1758_v28 = vpack.c.bf16 %v803_v19, %v802_v18  ;;  %v1099_v14 = vld [vmem:[#allocation10 + $0x150] sm:$0xff]  ;;  %v2505_v18 = vshrl.u32 %v615_v17, 7 }
 0x28a   : > { %695 = vmatmul.mubr.f32.vlgmr.msra.gmra.mrb[2].mxu0 %v2498_v21  ;;  %1593 = vmatmul.mubr.f32.vlgmr.msra.gmra.mrb[2].mxu1 %v2498_v21 }
 0x28b   : > { %1769 = vmatpush1.bf16.msra.mxu1 %v1768_v20  ;;  %1008 = vmatprep.mubr.f32.mxu1 %v2178_v1  ;;  %v1788_v20 = vpack.c.bf16 %v911_v11, %v908_v10  ;;  %v1115_v10 = vld [vmem:[#allocation10 + $0x1d0] sm:$0xff]  ;;  %v1116_v11 = vld [vmem:[#allocation10 + $0x1d8] sm:$0xff]  ;;  %v617_v19 = vsub.s32 0, %v2505_v18 }
 0x28c   : > { %1771 = vmatprep.subr.bf16.mxu1 %v1770_v23  ;;  %1737 = vmatpush3.bf16.msra.mxu0 %v1736_v27  ;;  %v914_v23 = vld [vmem:[#allocation8 + $0x2a0] sm:$0xff]  ;;  %v924_v27 = vld [vmem:[#allocation8 + $0x2f0] sm:$0xff] }
 0x28d   : > { %1739 = vmatprep.subr.bf16.mxu0 %v1738_v29  ;;  %v786_v29 = vld [vmem:[#allocation10 + $0x60] sm:$0xff]  ;;  %v1792_v31 = vpack.c.bf16 %v917_v24, %v914_v23  ;;  %v1794_v32 = vpack.c.bf16 %v924_v27, %v921_v25 }
 0x28e   : > { %v374_v27 = vld [vmem:[%s317_s11] sm:$0xff] }
 0x28f   : > { %1773 = vmatpush1.bf16.msra.mxu1 %v1772_v34  ;;  %v923_v34 = vld [vmem:[#allocation8 + $0x2e8] sm:$0xff] }
 0x290   : > { %1775 = vmatprep.subr.bf16.mxu1 %v1774_v35  ;;  %1741 = vmatpush3.bf16.msra.mxu0 %v1740_v39  ;;  %v1760_v35 = vpack.c.bf16 %v787_v30, %v786_v29  ;;  %v1796_v36 = vpack.c.bf16 %v923_v34, %v920_v33  ;;  %v1762_v39 = vpack.c.bf16 %v805_v38, %v804_v37  ;;  %v886_v38 = vld [vmem:[#allocation8 + $0x1c0] sm:$0xff] }
 0x291   : > { %1743 = vmatprep.subr.bf16.mxu0 %v1742_v41  ;;  %v789_v41 = vld [vmem:[#allocation10 + $0x78] sm:$0xff] }
 0x292   : > { %v1764_v42 = vpack.c.bf16 %v789_v41, %v788_v40  ;;  %v892_v41 = vld [vmem:[#allocation8 + $0x1f0] sm:$0xff] }
 0x293   : > { %1777 = vmatpush1.bf16.msra.mxu1 %v1776_v46  ;;  %v1822_v46 = vpack.c.bf16 %v1106_v44, %v1105_v43  ;;  %v898_v44 = vld [vmem:[#allocation8 + $0x220] sm:$0xff] }
 0x294   : > { %1779 = vmatprep.subr.bf16.mxu1 %v1778_v47  ;;  %1745 = vmatpush3.bf16.msra.mxu0 %v1744_v51  ;;  %v1090_v47 = vld [vmem:[#allocation10 + $0x108] sm:$0xff]  ;;  %v1826_v51 = vpack.c.bf16 %v1108_v49, %v1107_v48 }
 0x295   : > { %1747 = vmatprep.subr.bf16.mxu0 %v1746_v53  ;;  %v1824_v50 = vpack.c.bf16 %v1090_v47, %v1089_v45  ;;  %v1092_v53 = vld [vmem:[#allocation10 + $0x118] sm:$0xff]  ;;  %v904_v47 = vld [vmem:[#allocation8 + $0x250] sm:$0xff]  ;;  %v907_v48 = vld [vmem:[#allocation8 + $0x268] sm:$0xff] }
 0x296   : > { %v1828_v56 = vpack.c.bf16 %v1092_v53, %v1091_v52  ;;  %v901_v45 = vld [vmem:[#allocation8 + $0x238] sm:$0xff]  ;;  %v1811_v49 = vpack.c.bf16 %v907_v48, %v904_v47  ;;  %v916_v52 = vld [vmem:[#allocation8 + $0x2b0] sm:$0xff]  ;;  %v919_v53 = vld [vmem:[#allocation8 + $0x2c8] sm:$0xff] }
 0x297   : > { %1781 = vmatpush1.bf16.msra.mxu1 %v1780_v58  ;;  %v1093_v58 = vld [vmem:[#allocation10 + $0x120] sm:$0xff]  ;;  %v1817_v55 = vpack.c.bf16 %v919_v53, %v916_v52 }
 0x298   : > { %1783 = vmatprep.subr.bf16.mxu1 %v1782_v59  ;;  %1749 = vmatpush3.bf16.msra.mxu0 %v1748_v63  ;;  %v1094_v59 = vld [vmem:[#allocation10 + $0x128] sm:$0xff]  ;;  %v1834_v63 = vpack.c.bf16 %v1112_v61, %v1111_v60 }
 0x299   : > { %1751 = vmatprep.subr.bf16.mxu0 %v1750_v3  ;;  %v1832_v62 = vpack.c.bf16 %v1094_v59, %v1093_v58  ;;  %v1096_v3 = vld [vmem:[#allocation10 + $0x138] sm:$0xff] }
 0x29a   : > { %v1836_v6 = vpack.c.bf16 %v1096_v3, %v1095_v2  ;;  %v1117_v2 = vld [vmem:[#allocation10 + $0x1e0] sm:$0xff]  ;;  %v1118_v3 = vld [vmem:[#allocation10 + $0x1e8] sm:$0xff] }
 0x29b   : > { %1785 = vmatpush1.bf16.msra.mxu1 %v1784_v8  ;;  %v1097_v8 = vld [vmem:[#allocation10 + $0x140] sm:$0xff]  ;;  %v1846_v4 = vpack.c.bf16 %v1118_v3, %v1117_v2 }
 0x29c   : > { %1787 = vmatprep.subr.bf16.mxu1 %v1786_v9  ;;  %1753 = vmatpush3.bf16.msra.mxu0 %v1752_v13  ;;  %v1098_v9 = vld [vmem:[#allocation10 + $0x148] sm:$0xff]  ;;  %v1842_v13 = vpack.c.bf16 %v1116_v11, %v1115_v10  ;;  %v1103_v11 = vld [vmem:[#allocation10 + $0x170] sm:$0xff] }
 0x29d   : > { %1755 = vmatprep.subr.bf16.mxu0 %v1754_v15  ;;  %v1840_v12 = vpack.c.bf16 %v1098_v9, %v1097_v8  ;;  %v1100_v15 = vld [vmem:[#allocation10 + $0x158] sm:$0xff]  ;;  %v1119_v8 = vld [vmem:[#allocation10 + $0x1f0] sm:$0xff] }
 0x29e   : > { %v1844_v16 = vpack.c.bf16 %v1100_v15, %v1099_v14  ;;  %v1120_v9 = vld [vmem:[#allocation10 + $0x1f8] sm:$0xff]  ;;  %v932_v14 = vrot.slane %v1347_v54, %v617_v19 }
 0x29f   : > { %1789 = vmatpush1.bf16.msra.mxu1 %v1788_v20  ;;  %v2511_v20 = vld [vmem:[%s2593_s5] sm:$0x7]  ;;  %v1850_v10 = vpack.c.bf16 %v1120_v9, %v1119_v8 }
 0x2a0   : > { %1791 = vmatprep.subr.bf16.mxu1 %v1790_v22  ;;  %1757 = vmatpush3.bf16.msra.mxu0 %v1756_v26  ;;  %v621_v22 = vsub.s32 1, %v2505_v18  ;;  %v618_v23 = vrot.slane %v2511_v20, %v617_v19 }
 0x2a1   : > { %1759 = vmatprep.subr.bf16.mxu0 %v1758_v28 }
 0x2a2   : > { %v622_v24 = vrot.slane %v2511_v20, %v621_v22  ;;  %v936_v58 = vrot.slane %v1347_v54, %v621_v22 }
 0x2a3   : > { %1793 = vmatpush1.bf16.msra.mxu1 %v1792_v31  ;;  %v880_v31 = vld [vmem:[#allocation8 + $0x190] sm:$0xff] }
 0x2a4   : > { %1795 = vmatprep.subr.bf16.mxu1 %v1794_v32  ;;  %1761 = vmatpush3.bf16.msra.mxu0 %v1760_v35  ;;  %v883_v32 = vld [vmem:[#allocation8 + $0x1a8] sm:$0xff] }
 0x2a5   : > { %1763 = vmatprep.subr.bf16.mxu0 %v1762_v39  ;;  %v889_v39 = vld [vmem:[#allocation8 + $0x1d8] sm:$0xff] }
 0x2a6   : > { %v1802_v40 = vpack.c.bf16 %v889_v39, %v886_v38 }
 0x2a7   : > { %1797 = vmatpush1.bf16.msra.mxu1 %v1796_v36  ;;  %v1799_v36 = vpack.c.bf16 %v883_v32, %v880_v31 }
 0x2a8   : > { %1765 = vmatpush3.bf16.msra.mxu0 %v1764_v42  ;;  %1823 = vmatprep.subr.bf16.mxu1 %v1822_v46  ;;  %v895_v42 = vld [vmem:[#allocation8 + $0x208] sm:$0xff]  ;;  %v1808_v46 = vpack.c.bf16 %v901_v45, %v898_v44 }
 0x2a9   : > { %1798 = vmatprep.subr.bf16.mxu0 %v2176_v0  ;;  %v1805_v43 = vpack.c.bf16 %v895_v42, %v892_v41 }
 0x2aa   : > { %1009 = vmatmul.mubr.f32.vlgmr.msra.gmra.mrb[4].mxu1 %v2498_v21 }
 0x2ab   : > { %1825 = vmatpush3.bf16.msra.mxu1 %v1824_v50  ;;  %v913_v50 = vld [vmem:[#allocation8 + $0x298] sm:$0xff] }
 0x2ac   : > { %1827 = vmatprep.subr.bf16.mxu1 %v1826_v51 }
 0x2af   : > { %1829 = vmatpush3.bf16.msra.mxu1 %v1828_v56  ;;  %v922_v56 = vld [vmem:[#allocation8 + $0x2e0] sm:$0xff] }
 0x2b0   : > { %1831 = vmatprep.subr.bf16.mxu1 %v1830_v57  ;;  %v925_v57 = vld [vmem:[#allocation8 + $0x2f8] sm:$0xff] }
 0x2b1   : > { %v1820_v60 = vpack.c.bf16 %v925_v57, %v922_v56 }
 0x2b3   : > { %1833 = vmatpush3.bf16.msra.mxu1 %v1832_v62 }
 0x2b4   : > { %1835 = vmatprep.subr.bf16.mxu1 %v1834_v63 }
 0x2b7   : > { %1837 = vmatpush3.bf16.msra.mxu1 %v1836_v6  ;;  %v1102_v6 = vld [vmem:[#allocation10 + $0x168] sm:$0xff] }
 0x2b8   : > { %1839 = vmatprep.subr.bf16.mxu1 %v1838_v7  ;;  %v1848_v7 = vpack.c.bf16 %v1102_v6, %v1101_v5 }
 0x2bb   : > { %1841 = vmatpush3.bf16.msra.mxu1 %v1840_v12  ;;  %v1104_v12 = vld [vmem:[#allocation10 + $0x178] sm:$0xff] }
 0x2bc   : > { %1843 = vmatprep.subr.bf16.mxu1 %v1842_v13  ;;  %v625_v13 = vsub.s32 2, %v2505_v18 }
 0x2bf   : > { %1845 = vmatpush3.bf16.msra.mxu1 %v1844_v16 }
 0x2c0   : > { %1847 = vmatprep.subr.bf16.mxu1 %v1846_v4 }
 0x2c3   : > { %1849 = vmatpush3.bf16.msra.mxu1 %v1848_v7 }
 0x2c4   : > { %1851 = vmatprep.subr.bf16.mxu1 %v1850_v10 }
 0x35d   : > { %v696_v25 = vpop.f32.mrb[2].mxu0  ;;  %v2518_v26 = vpop.f32.mrb[2].mxu1 }
 0x35e   : > { %v697_v28 = vadd.f32 %v696_v25, %v618_v23  ;;  %v698_v29 = vpop.f32.mrb[3].mxu0  ;;  %v1594_v30 = vpop.f32.mrb[3].mxu1 }
 0x35f   : > { %v699_v33 = vadd.f32 %v698_v29, %v622_v24 }
 0x360   : > { %v771_v34 = vmax.f32 %v697_v28, 0.0 }
 0x361   : > { %v773_v35 = vmul.f32 %v699_v33, %v374_v27 }
 0x362   : > { %v772_v37 = vmul.f32 %v771_v34, %v374_v27 }
 0x363   : > { %870 = vmatprep.mubr.f32.mxu0 %v773_v35 }
 0x364   : > { %871 = vmatmul.mubr.f32.vlgmr.msra.gmra.mrb[4].mxu0 %v772_v37 }
 0x365   : > { %1800 = vmatpush3.bf16.msra.mxu0 %v1799_v36  ;;  %1627 = vmatprep.mubr.msk.f32.mxu0 %vm2177_vm0, %v2178_v1  ;;  %v910_v1 = vld [vmem:[#allocation8 + $0x280] sm:$0xff] }
 0x366   : > { %1801 = vmatprep.subr.bf16.mxu0 %v2176_v0  ;;  %v1814_v51 = vpack.c.bf16 %v913_v50, %v910_v1 }
 0x369   : > { %1803 = vmatpush3.bf16.msra.mxu0 %v1802_v40 }
 0x36a   : > { %1804 = vmatprep.subr.bf16.mxu0 %v2176_v0 }
 0x36d   : > { %1806 = vmatpush3.bf16.msra.mxu0 %v1805_v43 }
 0x36e   : > { %1807 = vmatprep.subr.bf16.mxu0 %v2176_v0 }
 0x371   : > { %1809 = vmatpush3.bf16.msra.mxu0 %v1808_v46 }
 0x372   : > { %1810 = vmatprep.subr.bf16.mxu0 %v2176_v0 }
 0x375   : > { %1812 = vmatpush3.bf16.msra.mxu0 %v1811_v49 }
 0x376   : > { %1813 = vmatprep.subr.bf16.mxu0 %v2176_v0 }
 0x379   : > { %1815 = vmatpush3.bf16.msra.mxu0 %v1814_v51 }
 0x37a   : > { %1816 = vmatprep.subr.bf16.mxu0 %v2176_v0 }
 0x37d   : > { %v1010_v59 = vpop.f32.mrb[4].mxu1  ;;  %1818 = vmatpush3.bf16.msra.mxu0 %v1817_v55 }
 0x37e   : > { %v1012_v61 = vpop.f32.mrb[5].mxu1  ;;  %1819 = vmatprep.subr.bf16.mxu0 %v2176_v0  ;;  %v1852_v0 = vpack.c.bf16 %v1104_v12, %v1103_v11  ;;  %v1011_v22 = vadd.f32 %v1010_v59, %v932_v14 }
 0x37f   : > { %v1013_v62 = vadd.f32 %v1012_v61, %v936_v58 }
 0x380   : > { %1853 = vmatpush3.bf16.msra.mxu1 %v1852_v0  ;;  %v1085_v25 = vmax.f32 %v1011_v22, 0.0 }
 0x381   : > { %v1087_v63 = vmul.f32 %v1013_v62, %v374_v27  ;;  %1821 = vmatpush3.bf16.msra.mxu0 %v1820_v60 }
 0x383   : > { %1185 = vmatprep.mubr.f32.mxu1 %v1087_v63 }
 0x384   : > { %1628 = vmatmul.mubr.f32.vlgmr.msra.gmra.mrb[6].mxu0 %v2498_v21  ;;  %v626_v21 = vrot.slane %v2511_v20, %v625_v13  ;;  %v940_v20 = vrot.slane %v1347_v54, %v625_v13 }
 0x386   : > { %v768_v17 = vadd.f32 %v2518_v26, %v626_v21 }
 0x437   : > { %v1435_v15 = vpop.f32.mrb[4].mxu0 }
 0x438   : > { %v1436_v16 = vpop.f32.mrb[5].mxu0 }
 0x439   : > { %v1437_v23 = vadd.f32 %v1436_v16, %v1435_v15 }
 0x43b   : > { %v873_v24 = vadd.f32 %v1437_v23, %v768_v17 }
 0x43d   : > { %v876_v27 = vmax.f32 %v873_v24, 0.0 }
 0x43f   : > { %v1086_v28 = vmul.f32 %v1085_v25, %v876_v27 }
 0x441   : > { %1186 = vmatmul.mubr.f32.vlgmr.msra.gmra.mrb[6].mxu1 %v1086_v28 }
 0x457   : > { %v1081_v29 = vpop.f32.mrb[6].mxu0 }
 0x458   : > { %v1629_v30 = vpop.f32.mrb[7].mxu0  ;;  %v1082_v31 = vadd.f32 %v1081_v29, %v940_v20 }
 0x514   : > { %v1487_v18 = vpop.f32.mrb[6].mxu1 }
 0x515   : > { %v1488_v19 = vpop.f32.mrb[7].mxu1 }
 0x516   : > { %v1489_v32 = vadd.f32 %v1488_v19, %v1487_v18 }
 0x518   : > { %v1188_v26 = vadd.f32 %v1489_v32, %v1082_v31 }
 0x51a   : > { %1191 = vst [vmem:[%s373_s14] sm:$0xff] %v1188_v26 }
 0x51b   : > { %2100 = shalt.err (!%p2097_p6)
}
 0x51c   : > { %s2101_s6 = scalar_lea.hbm %s2545_s9, 128  ;;  %s2105_s16 = scalar_lea.hbm %s2595_s7, 512 }
 0x51d   : > { %p2102_p2 = scmp.ne.s32.totalorder %s2545_s9, %s2101_s6  ;;  %p2106_p0 = scmp.lt.u32.totalorder %s2545_s9, %s2595_s7 }
 0x51e   : > { %p2107_p8 = scmp.lt.u32.totalorder %s2105_s16, %s2101_s6  ;;  %p2109_p3 = scmp.lt.u32.totalorder %s2101_s6, %s2545_s9 }
 0x51f   : > { %p2103_p11 = pnand %p2102_p2, %p2626_p7 }
 0x520   : > { %p2108_p13 = por %p2107_p8, %p2106_p0 }
 0x521   : > { %p2104_p10 = pneg %p2103_p11 }
 0x522   : > { %p2110_p9 = por %p2109_p3, %p2108_p13 }
 0x524   : > { %p2111_p12 = pnand %p2110_p9, %p2104_p10 }
 0x526   : > { %2114 = shalt.err (!%p2111_p12)
}
 0x527   : > { %1870 = dma.vmem_to_hbm [thread:$0]  (%p2626_p7), %s2547_s20, 128, %s2545_s9, %s1193_s29  }
 0x528 PF: > { %s2627_s4 = sld [smem:[#allocation17_spill]]  ;;  %p1900_p5 = scmp.ge.s32.totalorder %s2165_s27, 2 }
 0x529   : > { %s1218_s18 = sand.u32 1, %s2153_s24  }
 0x52a   : > { %s1219_s23 = scalar_lea.sflag [#allocation4], %s1218_s18 }
 0x52e   : > { %p2628_p1 = scmp.ne.s32.totalorder %s2627_s4, 0 }
 0x530   : > { %p1890_p4 = pnand %p1900_p5, %p2628_p1 }
 0x532   : > { %2148 = dma.done.wait (!%p1890_p4), %s1219_s23, 128  }
 0x533   : > { %2150 = vsyncadd (!%p1890_p4), %s1219_s23, 4294967168  ;;  %p24_p6 = scmp.ge.s32.totalorder %s2325_s21, 6   ;;  %s2629_s24 = smov %s2157_s25 }
 0x534   : > { %s2630_s25 = smov %s2161_s26  ;;  %s2631_s26 = smov %s2356_s13 }
 0x535   : > { %s2632_s27 = smov %s2325_s21  ;;  %26 = sbr.rel (!%p24_p6) target bundleno = 12 (0xc), region = 123 }
 0x53c   :  { %1224 = vsyncpa [#allocation3], 1 }
 0x53d   :  { %1226 = vsyncpa [#allocation3 + $0x1], 1 }
 0x53e   :  { %1227 = vsyncpa [#allocation6], 1 }
 0x53f   :  { %1229 = vsyncpa [#allocation6 + $0x1], 1 }
 0x540   :  { %1230 = vsyncpa [#allocation9], 1 }
 0x541   :  { %1231 = vsyncpa [#allocation4], 1 }
 0x542   :  { %1233 = vsyncpa [#allocation4 + $0x1], 1 }

</bundles_post_ra>
